<compile_context>
chip_gen: v7x
topology: tpu7x:2x2x1
jax: 0.10.0
libtpu: 0.0.40
codegen_flags: <defaults>
</compile_context>

<pallas_src>
import functools

import jax
import jax.numpy as jnp
from jax.experimental import pallas as pl
from jax.experimental.pallas import tpu as pltpu


def _dup_chunks(t, half, m):
    """[C_0 C_1 ... C_{m-1}] (chunk width `half`) -> [C_0 C_0 C_1 C_1 ...].

    t: (rows, m*half) f32.  Returns (rows, 2*m*half).
    m == 1: aligned concat.  m > 1 (m*half == 128): log2(m)-stage roll+select;
    each roll is by half the local period, so both roll directions agree.
    """
    if m == 1:
        return jnp.concatenate([t, t], axis=-1)
    lane = jax.lax.broadcasted_iota(jnp.int32, t.shape, 1)
    r64 = pltpu.roll(t, shift=64, axis=1)  # +64 == -64 (mod 128)
    tiles = []
    for tile_idx in range(2):
        # Fill all 128 lanes with the relevant 64-lane half of t (64-periodic).
        x = jnp.where(lane < 64,
                      t if tile_idx == 0 else r64,
                      r64 if tile_idx == 0 else t)
        qb = 128
        while qb > 2 * half:
            shift = qb // 4
            w = pltpu.roll(x, shift=shift, axis=1)
            pos_in_block = lane & (qb - 1)
            sel = (pos_in_block >= shift) & (pos_in_block < 3 * shift)
            x = jnp.where(sel, w, x)
            qb //= 2
        tiles.append(x)
    return jnp.concatenate(tiles, axis=-1)  # 128 + 128, aligned


def _rope_kernel(pos_ref, fm_ref, cos_ref, sin_ref, *, half, m, dedup):
    # pos_ref: (tR, m)  f32 positions (m folded positions per row)
    # fm_ref:  (m, W)   f32 inv_freq mask (row j carries inv_freq in chunk j)
    # cos_ref/sin_ref: (tR, m*dim_out) outputs in x.dtype (lane-dense)
    pos = pos_ref[...]
    fm = fm_ref[...]
    # freqs[r, j*half + c] = pos[r, j] * inv_freq[c]  (exact f32, no MXU)
    freqs = pos[:, 0:1] * fm[0:1, :]
    for j in range(1, m):
        freqs = freqs + pos[:, j:j + 1] * fm[j:j + 1, :]
    c = jnp.cos(freqs)                      # unique trig only (VPU)
    s = jnp.sin(freqs)
    if dedup:
        c = _dup_chunks(c, half, m)
        s = _dup_chunks(s, half, m)
    cos_ref[...] = c.astype(cos_ref.dtype)  # single lane-dense store each
    sin_ref[...] = s.astype(sin_ref.dtype)


def _ceil_div(a, b):
    return -(-a // b)


def _choose_tile_rows(batch, n_rows, m, w_out, out_bytes):
    # 2 outputs x 2 pipeline buffers must stay well under the smallest scoped-
    # VMEM default (v5e: 16 MiB) and v7x's 64 MiB physical VMEM.
    vmem_budget = 8 * 1024 * 1024
    cap = max(8, (vmem_budget // (4 * w_out * out_bytes)) // 8 * 8)
    t = max(8, min(2048 // max(m, 1), cap))          # ~2048 positions per step
    # Keep >= 4 grid steps when there is enough work (v7x megacore, pipelining).
    if batch * _ceil_div(n_rows, t) < 4:
        t = max(8, min(cap, ((_ceil_div(n_rows, 4) + 7) // 8) * 8))
    if t >= n_rows:
        return n_rows                                 # single full-extent block
    return t


def rotary_embedding_pallas(x, position_ids, dim, base=10000):
    """Pallas equivalent of _RotaryEmbedding.forward.

    x:            any array; only its dtype is used (as in the PyTorch module).
    position_ids: (B, L) integer positions.
    Returns (cos, sin), each (B, L, 2*len(inv_freq)) in x.dtype.
    """
    B, L = position_ids.shape
    out_dtype = x.dtype
    out_bytes = jnp.dtype(out_dtype).itemsize

    inv_freq = 1.0 / (base ** (jnp.arange(0, dim, 2, dtype=jnp.float32) / dim))
    half = int(inv_freq.shape[0])        # = ceil(dim/2), faithful for odd dim
    dim_out = 2 * half

    # Fold positions so (a) unique cos/sin work fills all 128 lanes and
    # (b) every output store is a multiple of 128 lanes.
    if half < 128 and 128 % half == 0 and half >= 16:
        m, dedup = 128 // half, True     # typical RoPE head dims 32/64/128
    elif half % 128 == 0:
        m, dedup = 1, True               # dim >= 256: dup is an aligned concat
    else:
        m, dedup = 1, False              # irregular dim: simple correct path

    w_out = m * dim_out

    if dedup:
        if m == 1:
            fm = inv_freq.reshape(1, half)
        else:
            eye = jnp.eye(m, dtype=jnp.float32)
            fm = (eye[:, :, None] * inv_freq[None, None, :]).reshape(m, m * half)
    else:
        fm = jnp.concatenate([inv_freq, inv_freq]).reshape(1, dim_out)

    n_rows = _ceil_div(L, m)
    t_rows = _choose_tile_rows(B, n_rows, m, w_out, out_bytes)
    n_rows_p = _ceil_div(n_rows, t_rows) * t_rows
    l_pad = n_rows_p * m

    # TODO(synk): positions >= 2^24 lose precision under this f32 cast, same as
    # the PyTorch module's .float() behaviour.
    pos = position_ids.astype(jnp.float32)
    if l_pad != L:
        pos = jnp.pad(pos, ((0, 0), (0, l_pad - L)))
    pos = pos.reshape(B, n_rows_p, m)

    grid = (B, n_rows_p // t_rows)
    kernel = functools.partial(_rope_kernel, half=half, m=m, dedup=dedup)

    cost = pl.CostEstimate(
        flops=4 * B * L * dim_out,
        transcendentals=2 * B * L * (half if dedup else dim_out),
        bytes_accessed=B * L * 4 + 2 * B * L * dim_out * out_bytes,
    )

    cos_f, sin_f = pl.pallas_call(
        kernel,
        out_shape=(
            jax.ShapeDtypeStruct((B, n_rows_p, w_out), out_dtype),
            jax.ShapeDtypeStruct((B, n_rows_p, w_out), out_dtype),
        ),
        grid_spec=pltpu.PrefetchScalarGridSpec(
            num_scalar_prefetch=0,
            grid=grid,
            in_specs=[
                # folded positions: one (batch, row-chunk) per step
                pl.BlockSpec((pl.Squeezed(), t_rows, m), lambda b, l: (b, l, 0)),
                # constant inverse-frequency mask (tiny, block never changes)
                pl.BlockSpec(fm.shape, lambda b, l: (0, 0)),
            ],
            out_specs=(
                pl.BlockSpec((pl.Squeezed(), t_rows, w_out),
                             lambda b, l: (b, l, 0)),
                pl.BlockSpec((pl.Squeezed(), t_rows, w_out),
                             lambda b, l: (b, l, 0)),
            ),
        ),
        compiler_params=pltpu.CompilerParams(
            dimension_semantics=("parallel", "parallel")),
        cost_estimate=cost,
    )(pos, fm)

    cos = cos_f.reshape(B, n_rows_p * m, dim_out)[:, :L, :]
    sin = sin_f.reshape(B, n_rows_p * m, dim_out)[:, :L, :]
    return cos, sin


def rotary_embedding_ref(x, position_ids, dim, base=10000):
    """Pure-JAX reference mirroring the PyTorch module."""
    inv_freq = 1.0 / (base ** (jnp.arange(0, dim, 2, dtype=jnp.float32) / dim))
    freqs = position_ids.astype(jnp.float32)[:, :, None] * inv_freq[None, None, :]
    emb = jnp.concatenate([freqs, freqs], axis=-1)
    return jnp.cos(emb).astype(x.dtype), jnp.sin(emb).astype(x.dtype)


if __name__ == "__main__":
    key = jax.random.PRNGKey(0)

    def run_case(B, L, dim, dtype, case_key, max_pos=1024, tol=2e-4):
        kx, kp = jax.random.split(case_key)
        x = jax.random.normal(kx, (B, L, dim), dtype)   # only dtype matters
        position_ids = jax.random.randint(kp, (B, L), 0, max_pos, dtype=jnp.int32)
        cos, sin = rotary_embedding_pallas(x, position_ids, dim)
        cos = jax.block_until_ready(cos)
        sin = jax.block_until_ready(sin)
        cos_r, sin_r = rotary_embedding_ref(x, position_ids, dim)
        half = (dim + 1) // 2
        assert cos.shape == (B, L, 2 * half) and sin.shape == (B, L, 2 * half)
        assert cos.dtype == dtype and sin.dtype == dtype
        err = max(
            float(jnp.max(jnp.abs(cos.astype(jnp.float32) - cos_r.astype(jnp.float32)))),
            float(jnp.max(jnp.abs(sin.astype(jnp.float32) - sin_r.astype(jnp.float32)))),
        )
        assert err < tol, f"(B={B}, L={L}, dim={dim}, {dtype}) max abs err {err}"

    keys = jax.random.split(key, 4)
    # Small shape consistent with the module (dim=32 -> 8-way position fold).
    run_case(2, 8, 32, jnp.float32, keys[0])
    # Multi-step tiled + folded + padded path, bf16 outputs (dim=128, m=2).
    run_case(2, 1000, 128, jnp.bfloat16, keys[1], tol=1e-2)
    # Odd L with 4-way fold (dim=64, m=4), exercises position padding.
    run_case(1, 257, 64, jnp.float32, keys[2])
    # half % 128 == 0 path (dim=256): aligned duplicate, no folding.
    run_case(1, 16, 256, jnp.float32, keys[3])

    print("KERNEL_OK")
</pallas_src>

<mosaic_0001>
module attributes {stable_mosaic.version = 11 : i64} {
  func.func @_rope_kernel(%arg0: i32, %arg1: i32, %arg2: memref<1x1x8xf32, #tpu.memory_space<vmem>>, %arg3: memref<8x128xf32, #tpu.memory_space<vmem>>, %arg4: memref<1x1x256xf32, #tpu.memory_space<vmem>>, %arg5: memref<1x1x256xf32, #tpu.memory_space<vmem>>) attributes {dimension_semantics = [#tpu.dimension_semantics<parallel>, #tpu.dimension_semantics<parallel>], iteration_bounds = array<i64: 2, 1>, scalar_prefetch = 0 : i64, scratch_operands = 0 : i64, tpu.core_type = #tpu.core_type<tc>, window_params = [{transform_indices = @transform_0, window_bounds = array<i64: 1, 1, 8>}, {pipeline_mode = #tpu.pipeline_mode<synchronous>, transform_indices = @transform_1, window_bounds = array<i64: 8, 128>}, {transform_indices = @transform_2, window_bounds = array<i64: 1, 1, 256>}, {transform_indices = @transform_3, window_bounds = array<i64: 1, 1, 256>}]} {
    %c0 = arith.constant 0 : index
    %c0_0 = arith.constant 0 : index
    %c0_1 = arith.constant 0 : index
    %0 = vector.load %arg2[%c0, %c0_0, %c0_1] : memref<1x1x8xf32, #tpu.memory_space<vmem>>, vector<1x1x8xf32>
    %1 = vector.shape_cast %0 : vector<1x1x8xf32> to vector<1x8xf32>
    %c0_2 = arith.constant 0 : index
    %c0_3 = arith.constant 0 : index
    %2 = vector.load %arg3[%c0_2, %c0_3] : memref<8x128xf32, #tpu.memory_space<vmem>>, vector<8x128xf32>
    %3 = vector.extract_strided_slice %1 {offsets = [0, 0], sizes = [1, 1], strides = [1, 1]} : vector<1x8xf32> to vector<1x1xf32>
    %4 = vector.extract_strided_slice %2 {offsets = [0, 0], sizes = [1, 128], strides = [1, 1]} : vector<8x128xf32> to vector<1x128xf32>
    %5 = vector.broadcast %3 : vector<1x1xf32> to vector<1x128xf32>
    %6 = arith.mulf %5, %4 : vector<1x128xf32>
    %7 = vector.extract_strided_slice %1 {offsets = [0, 1], sizes = [1, 1], strides = [1, 1]} : vector<1x8xf32> to vector<1x1xf32>
    %8 = vector.extract_strided_slice %2 {offsets = [1, 0], sizes = [1, 128], strides = [1, 1]} : vector<8x128xf32> to vector<1x128xf32>
    %9 = vector.broadcast %7 : vector<1x1xf32> to vector<1x128xf32>
    %10 = arith.mulf %9, %8 : vector<1x128xf32>
    %11 = arith.addf %6, %10 : vector<1x128xf32>
    %12 = vector.extract_strided_slice %1 {offsets = [0, 2], sizes = [1, 1], strides = [1, 1]} : vector<1x8xf32> to vector<1x1xf32>
    %13 = vector.extract_strided_slice %2 {offsets = [2, 0], sizes = [1, 128], strides = [1, 1]} : vector<8x128xf32> to vector<1x128xf32>
    %14 = vector.broadcast %12 : vector<1x1xf32> to vector<1x128xf32>
    %15 = arith.mulf %14, %13 : vector<1x128xf32>
    %16 = arith.addf %11, %15 : vector<1x128xf32>
    %17 = vector.extract_strided_slice %1 {offsets = [0, 3], sizes = [1, 1], strides = [1, 1]} : vector<1x8xf32> to vector<1x1xf32>
    %18 = vector.extract_strided_slice %2 {offsets = [3, 0], sizes = [1, 128], strides = [1, 1]} : vector<8x128xf32> to vector<1x128xf32>
    %19 = vector.broadcast %17 : vector<1x1xf32> to vector<1x128xf32>
    %20 = arith.mulf %19, %18 : vector<1x128xf32>
    %21 = arith.addf %16, %20 : vector<1x128xf32>
    %22 = vector.extract_strided_slice %1 {offsets = [0, 4], sizes = [1, 1], strides = [1, 1]} : vector<1x8xf32> to vector<1x1xf32>
    %23 = vector.extract_strided_slice %2 {offsets = [4, 0], sizes = [1, 128], strides = [1, 1]} : vector<8x128xf32> to vector<1x128xf32>
    %24 = vector.broadcast %22 : vector<1x1xf32> to vector<1x128xf32>
    %25 = arith.mulf %24, %23 : vector<1x128xf32>
    %26 = arith.addf %21, %25 : vector<1x128xf32>
    %27 = vector.extract_strided_slice %1 {offsets = [0, 5], sizes = [1, 1], strides = [1, 1]} : vector<1x8xf32> to vector<1x1xf32>
    %28 = vector.extract_strided_slice %2 {offsets = [5, 0], sizes = [1, 128], strides = [1, 1]} : vector<8x128xf32> to vector<1x128xf32>
    %29 = vector.broadcast %27 : vector<1x1xf32> to vector<1x128xf32>
    %30 = arith.mulf %29, %28 : vector<1x128xf32>
    %31 = arith.addf %26, %30 : vector<1x128xf32>
    %32 = vector.extract_strided_slice %1 {offsets = [0, 6], sizes = [1, 1], strides = [1, 1]} : vector<1x8xf32> to vector<1x1xf32>
    %33 = vector.extract_strided_slice %2 {offsets = [6, 0], sizes = [1, 128], strides = [1, 1]} : vector<8x128xf32> to vector<1x128xf32>
    %34 = vector.broadcast %32 : vector<1x1xf32> to vector<1x128xf32>
    %35 = arith.mulf %34, %33 : vector<1x128xf32>
    %36 = arith.addf %31, %35 : vector<1x128xf32>
    %37 = vector.extract_strided_slice %1 {offsets = [0, 7], sizes = [1, 1], strides = [1, 1]} : vector<1x8xf32> to vector<1x1xf32>
    %38 = vector.extract_strided_slice %2 {offsets = [7, 0], sizes = [1, 128], strides = [1, 1]} : vector<8x128xf32> to vector<1x128xf32>
    %39 = vector.broadcast %37 : vector<1x1xf32> to vector<1x128xf32>
    %40 = arith.mulf %39, %38 : vector<1x128xf32>
    %41 = arith.addf %36, %40 : vector<1x128xf32>
    %42 = math.cos %41 : vector<1x128xf32>
    %43 = math.sin %41 : vector<1x128xf32>
    %44 = tpu.iota {dimensions = array<i32: 1>} : vector<1x128xi32>
    %c64_i32 = arith.constant 64 : i32
    %45 = tpu.dynamic_rotate %42 by %c64_i32 dim 1 : vector<1x128xf32>, i32 -> vector<1x128xf32>
    %c64_i32_4 = arith.constant 64 : i32
    %46 = vector.broadcast %c64_i32_4 : i32 to vector<1x128xi32>
    %47 = arith.cmpi slt, %44, %46 : vector<1x128xi32>
    %48 = arith.select %47, %42, %45 : vector<1x128xi1>, vector<1x128xf32>
    %c32_i32 = arith.constant 32 : i32
    %49 = tpu.dynamic_rotate %48 by %c32_i32 dim 1 : vector<1x128xf32>, i32 -> vector<1x128xf32>
    %c127_i32 = arith.constant 127 : i32
    %50 = vector.broadcast %c127_i32 : i32 to vector<1x128xi32>
    %51 = arith.andi %44, %50 : vector<1x128xi32>
    %c32_i32_5 = arith.constant 32 : i32
    %52 = vector.broadcast %c32_i32_5 : i32 to vector<1x128xi32>
    %53 = arith.cmpi sge, %51, %52 : vector<1x128xi32>
    %c96_i32 = arith.constant 96 : i32
    %54 = vector.broadcast %c96_i32 : i32 to vector<1x128xi32>
    %55 = arith.cmpi slt, %51, %54 : vector<1x128xi32>
    %56 = arith.andi %53, %55 : vector<1x128xi1>
    %57 = arith.select %56, %49, %48 : vector<1x128xi1>, vector<1x128xf32>
    %c16_i32 = arith.constant 16 : i32
    %58 = tpu.dynamic_rotate %57 by %c16_i32 dim 1 : vector<1x128xf32>, i32 -> vector<1x128xf32>
    %c63_i32 = arith.constant 63 : i32
    %59 = vector.broadcast %c63_i32 : i32 to vector<1x128xi32>
    %60 = arith.andi %44, %59 : vector<1x128xi32>
    %c16_i32_6 = arith.constant 16 : i32
    %61 = vector.broadcast %c16_i32_6 : i32 to vector<1x128xi32>
    %62 = arith.cmpi sge, %60, %61 : vector<1x128xi32>
    %c48_i32 = arith.constant 48 : i32
    %63 = vector.broadcast %c48_i32 : i32 to vector<1x128xi32>
    %64 = arith.cmpi slt, %60, %63 : vector<1x128xi32>
    %65 = arith.andi %62, %64 : vector<1x128xi1>
    %66 = arith.select %65, %58, %57 : vector<1x128xi1>, vector<1x128xf32>
    %c64_i32_7 = arith.constant 64 : i32
    %67 = vector.broadcast %c64_i32_7 : i32 to vector<1x128xi32>
    %68 = arith.cmpi slt, %44, %67 : vector<1x128xi32>
    %69 = arith.select %68, %45, %42 : vector<1x128xi1>, vector<1x128xf32>
    %c32_i32_8 = arith.constant 32 : i32
    %70 = tpu.dynamic_rotate %69 by %c32_i32_8 dim 1 : vector<1x128xf32>, i32 -> vector<1x128xf32>
    %c127_i32_9 = arith.constant 127 : i32
    %71 = vector.broadcast %c127_i32_9 : i32 to vector<1x128xi32>
    %72 = arith.andi %44, %71 : vector<1x128xi32>
    %c32_i32_10 = arith.constant 32 : i32
    %73 = vector.broadcast %c32_i32_10 : i32 to vector<1x128xi32>
    %74 = arith.cmpi sge, %72, %73 : vector<1x128xi32>
    %c96_i32_11 = arith.constant 96 : i32
    %75 = vector.broadcast %c96_i32_11 : i32 to vector<1x128xi32>
    %76 = arith.cmpi slt, %72, %75 : vector<1x128xi32>
    %77 = arith.andi %74, %76 : vector<1x128xi1>
    %78 = arith.select %77, %70, %69 : vector<1x128xi1>, vector<1x128xf32>
    %c16_i32_12 = arith.constant 16 : i32
    %79 = tpu.dynamic_rotate %78 by %c16_i32_12 dim 1 : vector<1x128xf32>, i32 -> vector<1x128xf32>
    %c63_i32_13 = arith.constant 63 : i32
    %80 = vector.broadcast %c63_i32_13 : i32 to vector<1x128xi32>
    %81 = arith.andi %44, %80 : vector<1x128xi32>
    %c16_i32_14 = arith.constant 16 : i32
    %82 = vector.broadcast %c16_i32_14 : i32 to vector<1x128xi32>
    %83 = arith.cmpi sge, %81, %82 : vector<1x128xi32>
    %c48_i32_15 = arith.constant 48 : i32
    %84 = vector.broadcast %c48_i32_15 : i32 to vector<1x128xi32>
    %85 = arith.cmpi slt, %81, %84 : vector<1x128xi32>
    %86 = arith.andi %83, %85 : vector<1x128xi1>
    %87 = arith.select %86, %79, %78 : vector<1x128xi1>, vector<1x128xf32>
    %88 = tpu.concatenate %66, %87 in 1 : vector<1x128xf32>, vector<1x128xf32> -> vector<1x256xf32>
    %89 = tpu.iota {dimensions = array<i32: 1>} : vector<1x128xi32>
    %c64_i32_16 = arith.constant 64 : i32
    %90 = tpu.dynamic_rotate %43 by %c64_i32_16 dim 1 : vector<1x128xf32>, i32 -> vector<1x128xf32>
    %c64_i32_17 = arith.constant 64 : i32
    %91 = vector.broadcast %c64_i32_17 : i32 to vector<1x128xi32>
    %92 = arith.cmpi slt, %89, %91 : vector<1x128xi32>
    %93 = arith.select %92, %43, %90 : vector<1x128xi1>, vector<1x128xf32>
    %c32_i32_18 = arith.constant 32 : i32
    %94 = tpu.dynamic_rotate %93 by %c32_i32_18 dim 1 : vector<1x128xf32>, i32 -> vector<1x128xf32>
    %c127_i32_19 = arith.constant 127 : i32
    %95 = vector.broadcast %c127_i32_19 : i32 to vector<1x128xi32>
    %96 = arith.andi %89, %95 : vector<1x128xi32>
    %c32_i32_20 = arith.constant 32 : i32
    %97 = vector.broadcast %c32_i32_20 : i32 to vector<1x128xi32>
    %98 = arith.cmpi sge, %96, %97 : vector<1x128xi32>
    %c96_i32_21 = arith.constant 96 : i32
    %99 = vector.broadcast %c96_i32_21 : i32 to vector<1x128xi32>
    %100 = arith.cmpi slt, %96, %99 : vector<1x128xi32>
    %101 = arith.andi %98, %100 : vector<1x128xi1>
    %102 = arith.select %101, %94, %93 : vector<1x128xi1>, vector<1x128xf32>
    %c16_i32_22 = arith.constant 16 : i32
    %103 = tpu.dynamic_rotate %102 by %c16_i32_22 dim 1 : vector<1x128xf32>, i32 -> vector<1x128xf32>
    %c63_i32_23 = arith.constant 63 : i32
    %104 = vector.broadcast %c63_i32_23 : i32 to vector<1x128xi32>
    %105 = arith.andi %89, %104 : vector<1x128xi32>
    %c16_i32_24 = arith.constant 16 : i32
    %106 = vector.broadcast %c16_i32_24 : i32 to vector<1x128xi32>
    %107 = arith.cmpi sge, %105, %106 : vector<1x128xi32>
    %c48_i32_25 = arith.constant 48 : i32
    %108 = vector.broadcast %c48_i32_25 : i32 to vector<1x128xi32>
    %109 = arith.cmpi slt, %105, %108 : vector<1x128xi32>
    %110 = arith.andi %107, %109 : vector<1x128xi1>
    %111 = arith.select %110, %103, %102 : vector<1x128xi1>, vector<1x128xf32>
    %c64_i32_26 = arith.constant 64 : i32
    %112 = vector.broadcast %c64_i32_26 : i32 to vector<1x128xi32>
    %113 = arith.cmpi slt, %89, %112 : vector<1x128xi32>
    %114 = arith.select %113, %90, %43 : vector<1x128xi1>, vector<1x128xf32>
    %c32_i32_27 = arith.constant 32 : i32
    %115 = tpu.dynamic_rotate %114 by %c32_i32_27 dim 1 : vector<1x128xf32>, i32 -> vector<1x128xf32>
    %c127_i32_28 = arith.constant 127 : i32
    %116 = vector.broadcast %c127_i32_28 : i32 to vector<1x128xi32>
    %117 = arith.andi %89, %116 : vector<1x128xi32>
    %c32_i32_29 = arith.constant 32 : i32
    %118 = vector.broadcast %c32_i32_29 : i32 to vector<1x128xi32>
    %119 = arith.cmpi sge, %117, %118 : vector<1x128xi32>
    %c96_i32_30 = arith.constant 96 : i32
    %120 = vector.broadcast %c96_i32_30 : i32 to vector<1x128xi32>
    %121 = arith.cmpi slt, %117, %120 : vector<1x128xi32>
    %122 = arith.andi %119, %121 : vector<1x128xi1>
    %123 = arith.select %122, %115, %114 : vector<1x128xi1>, vector<1x128xf32>
    %c16_i32_31 = arith.constant 16 : i32
    %124 = tpu.dynamic_rotate %123 by %c16_i32_31 dim 1 : vector<1x128xf32>, i32 -> vector<1x128xf32>
    %c63_i32_32 = arith.constant 63 : i32
    %125 = vector.broadcast %c63_i32_32 : i32 to vector<1x128xi32>
    %126 = arith.andi %89, %125 : vector<1x128xi32>
    %c16_i32_33 = arith.constant 16 : i32
    %127 = vector.broadcast %c16_i32_33 : i32 to vector<1x128xi32>
    %128 = arith.cmpi sge, %126, %127 : vector<1x128xi32>
    %c48_i32_34 = arith.constant 48 : i32
    %129 = vector.broadcast %c48_i32_34 : i32 to vector<1x128xi32>
    %130 = arith.cmpi slt, %126, %129 : vector<1x128xi32>
    %131 = arith.andi %128, %130 : vector<1x128xi1>
    %132 = arith.select %131, %124, %123 : vector<1x128xi1>, vector<1x128xf32>
    %133 = tpu.concatenate %111, %132 in 1 : vector<1x128xf32>, vector<1x128xf32> -> vector<1x256xf32>
    %c0_35 = arith.constant 0 : index
    %c0_36 = arith.constant 0 : index
    %c0_37 = arith.constant 0 : index
    %134 = vector.load %arg4[%c0_35, %c0_36, %c0_37] : memref<1x1x256xf32, #tpu.memory_space<vmem>>, vector<1x1x256xf32>
    %135 = vector.shape_cast %134 : vector<1x1x256xf32> to vector<1x256xf32>
    %136 = vector.shape_cast %88 : vector<1x256xf32> to vector<1x1x256xf32>
    tpu.vector_store %arg4[%c0_35, %c0_36, %c0_37], %136 {strides = array<i32>} : memref<1x1x256xf32, #tpu.memory_space<vmem>>, vector<1x1x256xf32>,
    %c0_38 = arith.constant 0 : index
    %c0_39 = arith.constant 0 : index
    %c0_40 = arith.constant 0 : index
    %137 = vector.load %arg5[%c0_38, %c0_39, %c0_40] : memref<1x1x256xf32, #tpu.memory_space<vmem>>, vector<1x1x256xf32>
    %138 = vector.shape_cast %137 : vector<1x1x256xf32> to vector<1x256xf32>
    %139 = vector.shape_cast %133 : vector<1x256xf32> to vector<1x1x256xf32>
    tpu.vector_store %arg5[%c0_38, %c0_39, %c0_40], %139 {strides = array<i32>} : memref<1x1x256xf32, #tpu.memory_space<vmem>>, vector<1x1x256xf32>,
    return
  }
  func.func @transform_0(%arg0: i32, %arg1: i32) -> (i32, i32, i32) {
    %c0_i32 = arith.constant 0 : i32
    %c0_i32_0 = arith.constant 0 : i32
    return %arg0, %arg1, %c0_i32 : i32, i32, i32
  }
  func.func @transform_1(%arg0: i32, %arg1: i32) -> (i32, i32) {
    %c0_i32 = arith.constant 0 : i32
    %c0_i32_0 = arith.constant 0 : i32
    %c0_i32_1 = arith.constant 0 : i32
    return %c0_i32, %c0_i32_0 : i32, i32
  }
  func.func @transform_2(%arg0: i32, %arg1: i32) -> (i32, i32, i32) {
    %c0_i32 = arith.constant 0 : i32
    %c0_i32_0 = arith.constant 0 : i32
    return %arg0, %arg1, %c0_i32 : i32, i32, i32
  }
  func.func @transform_3(%arg0: i32, %arg1: i32) -> (i32, i32, i32) {
    %c0_i32 = arith.constant 0 : i32
    %c0_i32_0 = arith.constant 0 : i32
    return %arg0, %arg1, %c0_i32 : i32, i32, i32
  }
}

</mosaic_0001>

<bundles_post_ra>
// kernel: tpu_custom_call.1
= control target key start
LH: loop header
LB: loop body
LE: loop exit
PB: predicated region body
PF: predicated region fallthrough
CT: control target
= control target key end

     0   :  { %9 = vsyncpa [#allocation3], 0  ;;  %s1448_s0 = inlined_call_operand.hbm [shape: f32[2,1,8], index: 0, kind: input, shape index: {}]   ;;  %s1449_s1 = inlined_call_operand.hbm [shape: f32[8,128], index: 1, kind: input, shape index: {}]   ;;  %s1450_s2 = inlined_call_operand.hbm [shape: f32[2,1,256], index: 2, kind: output, shape index: {0}]   ;;  %s1451_s3 = inlined_call_operand.hbm [shape: f32[2,1,256], index: 3, kind: output, shape index: {1}]  }
   0x1   :  { %11 = vsyncpa [#allocation3 + $0x1], 0 }
   0x2   :  { %12 = vsyncpa [#allocation6], 0 }
   0x3   :  { %13 = vsyncpa [#allocation4], 0 }
   0x4   :  { %15 = vsyncpa [#allocation4 + $0x1], 0 }
   0x5   :  { %16 = vsyncpa [#allocation9], 0 }
   0x6   :  { %18 = vsyncpa [#allocation9 + $0x1], 0  ;;  %s1144_s12 = smov 0   ;;  %s1146_s13 = smov 0  }
   0x7   :  { %s1148_s14 = smov 0   ;;  %s1150_s15 = smov 0  }
   0x8   :  { %s1152_s16 = smov 0   ;;  %s1154_s17 = smov 0  }
   0x9 LB: > { %s783_s18 = sadd.s32 4294967295, %s1100_s17   ;;  %s784_s19 = sadd.s32 4294967294, %s1100_s17   ;;  %s1100_s17 = sphi %s1154_s17, %s24_s17   ;;  %s1096_s16 = sphi %s1152_s16, %s1480_s16   ;;  %s1092_s15 = sphi %s1150_s15, %s1479_s15   ;;  %s1088_s14 = sphi %s1148_s14, %s1478_s14   ;;  %s1084_s13 = sphi %s1146_s13, %s1477_s13   ;;  %s1080_s12 = sphi %s1144_s12, %s1476_s12  }
   0xa   : > { %p58_p0 = scmp.ne.s32.totalorder %s1084_s13, %s1080_s12  ;;  %p1178_p1 = scmp.eq.s32.totalorder %s783_s18, 0 }
   0xb   : > { %p1182_p2 = scmp.eq.s32.totalorder %s783_s18, 1  ;;  %p111_p3 = scmp.eq.s32.totalorder %s784_s19, 1 }
   0xc   : > { %s1456_s20 = scalar_select %p1178_p1, 1, 0 }
   0xd   : > { %s1457_s21 = scalar_select %p1182_p2, 1, 0 }
   0xe   : > { %p1188_p4 = por %p1178_p1, %p58_p0  ;;  %p785_p5 = scmp.ge.s32.totalorder %s1100_s17, 1 }
   0xf   : > { %p1193_p6 = por %p111_p3, %p58_p0  ;;  %p146_p7 = scmp.lt.s32.totalorder %s1100_s17, 3 }
  0x10   : > { %s1458_s22 = scalar_select %p1188_p4, 1, 0 }
  0x11   : > { %s1459_s23 = scalar_select %p1193_p6, 1, 0 }
  0x12   : > { %p1198_p8 = pnand %p785_p5, %p146_p7  ;;  %s1102_s25 = smov [#allocation5]  }
  0x13   : > { %s159_s26 = sshll.u32 %s1102_s25, 4  ;;  %s36_s28 = sadd.s32 1, %s1096_s16  ;;  %s160_s26 = int_to_ptr.vmem [resolvable:$true] %s159_s26 }
  0x14   : > { %s1460_s24 = scalar_select %p1198_p8, 1, 0 }
  0x15   : > { %p825_p10 = pneg %p1198_p8  ;;  %s45_s29 = sadd.s32 1, %s1088_s14 }
  0x16   : > { %p1213_p12 = scmp.ge.s32.totalorder %s36_s28, 2  ;;  %s924_s6 = scalar_lea.hbm %s1449_s1, 128 }
  0x17   : > { %p1207_p11 = pnand %p825_p10, %p1178_p1  ;;  %p925_p13 = scmp.ne.s32.totalorder %s1449_s1, %s924_s6 }
  0x18   : > { %s1462_s30 = scalar_select %p1213_p12, 1, 0 }
  0x19   : > { %p926_p0 = pneg %p1207_p11  ;;  %p931_p7 = scmp.lt.u32.totalorder %s924_s6, %s1449_s1 }
  0x1b   : > { %p927_p3 = pnand %p926_p0, %p925_p13 }
  0x1d   : > { %p928_p5 = pneg %p927_p3 }
  0x1f   : > { %p933_p10 = pnand %p931_p7, %p928_p5 }
  0x21   : > { %936 = shalt.err (!%p933_p10)
}
  0x22   : > { %s937_s11 = scalar_lea.vmem %s160_s26, 128  ;;  %p945_p4 = scmp.lt.s32.totalorder %s160_s26, %s160_s26 }
  0x23   : > { %p938_p9 = scmp.ne.s32.totalorder %s160_s26, %s937_s11  ;;  %p946_p8 = scmp.lt.s32.totalorder %s937_s11, %s937_s11 }
  0x25   : > { %p940_p6 = pnand %p938_p9, %p926_p0  ;;  %p947_p2 = por %p946_p8, %p945_p4 }
  0x27   : > { %p941_p1 = pneg %p940_p6 }
  0x29   : > { %p948_p12 = pnand %p947_p2, %p941_p1 }
  0x2b   : > { %951 = shalt.err (!%p948_p12)
}
  0x2c   : > { %828 = dma.hbm_to_vmem [thread:$0]  (!%p1207_p11), %s1449_s1, 128, %s160_s26, [#allocation6]  }
  0x2d   : > { %p1463_p4 = scmp.ne.s32.totalorder %s1462_s30, 0  ;;  %p52_p1 = scmp.ne.s32.totalorder %s1088_s14, %s1084_s13 }
  0x2e   : > { %p53_p2 = scmp.eq.s32.totalorder %s1100_s17, 0  ;;  %p841_p6 = scmp.lt.s32.totalorder %s1100_s17, 2 }
  0x2f   : > { %s1482_s28 = smov (%p1463_p4, %s36_s28), 0  ;;  %p1464_p12 = scmp.ne.s32.totalorder %s1457_s21, 0 }
  0x30   : > { %s40_s25 = ssub.s32 %s1096_s16, %s1482_s28  ;;  %p54_p9 = por %p53_p2, %p52_p1 }
  0x31   : > { %p43_p8 = scmp.eq.s32.totalorder %s40_s25, 0  ;;  %p1245_p13 = por %p1464_p12, %p52_p1 }
  0x32   : > { %s170_s4 = sand.u32 1, %s1088_s14   ;;  %s788_s26 = sshll.u32 %s1096_s16, 4 }
  0x33   : > { %s1253_s5 = scalar_select %p43_p8, %s1088_s14, %s45_s29  }
  0x34   : > { %s173_s30 = scalar_lea.vmem [#allocation2], %s170_s4  ;;  %s1259_s9 = scalar_lea.hbm %s1448_s0, %s788_s26 }
  0x35   : > { %s181_s6 = sshll.u32 %s173_s30, 4  ;;  %p1263_p11 = pnand %p841_p6, %p54_p9  ;;  %s1261_s6 = int_to_ptr.vmem [resolvable:$true] %s181_s6 }
  0x36   : > { %s171_s29 = scalar_lea.sflag [#allocation3], %s170_s4  ;;  %s952_s10 = scalar_lea.hbm %s1259_s9, 16 }
  0x37   : > { %p953_p0 = scmp.ne.s32.totalorder %s1259_s9, %s952_s10  ;;  %p954_p3 = pneg %p1263_p11 }
  0x38   : > { %s957_s19 = scalar_lea.hbm %s1448_s0, 32  ;;  %p958_p10 = scmp.lt.u32.totalorder %s1259_s9, %s1448_s0 }
  0x39   : > { %p955_p5 = pnand %p954_p3, %p953_p0  ;;  %p959_p4 = scmp.lt.u32.totalorder %s957_s19, %s952_s10 }
  0x3a   : > { %p961_p2 = scmp.lt.u32.totalorder %s952_s10, %s1259_s9 }
  0x3b   : > { %p956_p7 = pneg %p955_p5  ;;  %p960_p1 = por %p959_p4, %p958_p10 }
  0x3d   : > { %p962_p6 = por %p961_p2, %p960_p1 }
  0x3f   : > { %p963_p8 = pnand %p962_p6, %p956_p7 }
  0x41   : > { %966 = shalt.err (!%p963_p8)
}
  0x42   : > { %s967_s4 = scalar_lea.vmem %s1261_s6, 16  ;;  %s1103_s30 = smov [#allocation2]  }
  0x43   : > { %p968_p9 = scmp.ne.s32.totalorder %s1261_s6, %s967_s4  ;;  %s972_s7 = sshll.u32 %s1103_s30, 4  ;;  %s973_s7 = int_to_ptr.vmem [resolvable:$false] %s972_s7 }
  0x44   : > { %s974_s8 = scalar_lea.vmem %s973_s7, 32  ;;  %p975_p5 = scmp.lt.s32.totalorder %s1261_s6, %s973_s7 }
  0x45   : > { %p970_p12 = pnand %p968_p9, %p954_p3  ;;  %p976_p10 = scmp.lt.s32.totalorder %s974_s8, %s967_s4 }
  0x47   : > { %p971_p0 = pneg %p970_p12  ;;  %p977_p4 = por %p976_p10, %p975_p5 }
  0x49   : > { %p978_p1 = pnand %p977_p4, %p971_p0 }
  0x4b   : > { %981 = shalt.err (!%p978_p1)
}
  0x4c   : > { %832 = dma.hbm_to_vmem [thread:$0]  (!%p1263_p11), %s1259_s9, 16, %s1261_s6, %s171_s29  }
  0x4d   : > { %p1467_p7 = scmp.ne.s32.totalorder %s1460_s24, 0 }
  0x4e   : > { %s1295_s10 = sand.u32 (!%p1467_p7), 1, %s1084_s13   ;;  %p1468_p3 = scmp.ne.s32.totalorder (!%p1467_p7), %s1458_s22, 0 }
  0x4f   : > { %190 = sbr.rel (%p1467_p7) target bundleno = 718 (0x2ce), region = 28  ;;  %s193_s11 = scalar_lea.sflag (!%p1467_p7), [#allocation3], %s1295_s10 }
  0x50   : > { %s195_s18 = scalar_lea.vmem (!%p1467_p7), [#allocation2], %s1295_s10 }
  0x56   : > { %1063 = dma.done.wait (%p1468_p3), %s193_s11, 16  }
  0x57   : > { %1065 = vsyncadd (%p1468_p3), %s193_s11, 4294967280  ;;  %p1469_p2 = scmp.ne.s32.totalorder %s1456_s20, 0 }
  0x59   : > { %1067 = dma.done.wait (%p1469_p2), [#allocation6], 128  }
  0x5a   : > { %1069 = vsyncadd (%p1469_p2), [#allocation6], 4294967168  ;;  %v1104_v0 = vmov 2   ;;  %v1105_v1 = vmov 1   ;;  %v226_v2 = vld [vmem:[%s195_s18] sm:$0x1]  ;;  %v233_v9 = vlaneseq }
  0x5b   : > { %913 = vset.pattern.permute.xlu1 %v1104_v0  ;;  %911 = vset.pattern.permute.xlu0 %v1105_v1  ;;  %v1106_v3 = vmov 3   ;;  %v1107_v4 = vmov 0   ;;  %v1108_v5 = vmov 4   ;;  %v1109_v6 = vmov 5   ;;  %v227_v15 = vld [vmem:[#allocation5] sm:$0xff]  ;;  %s1118_s20 = smov 64  }
  0x5c   : > { %252 = vperm.xlu1 %913, %v226_v2   ;;  %239 = vperm.xlu0 %911, %v226_v2   ;;  %v1110_v7 = vmov 6   ;;  %v1111_v8 = vmov 7   ;;  %v1308_v10 = vshrl.u32 %v233_v9, 7  ;;  %v1112_v61 = vmov 683565275   ;;  %s1119_s22 = smov 32  }
  0x5d   : > { %v1113_v63 = vmov 2475754826   ;;  %s1120_s24 = smov 16   ;;  %s791_s6 = sshll.u32 %s1295_s10, 1 }
  0x5e   : > { %v235_v11 = vsub.s32 0, %v1308_v10  ;;  %s809_s9 = sshll.u32 %s1092_s15, 5  ;;  %s218_s21 = scalar_lea.vmem [#allocation7], %s791_s6 }
  0x5f   : > { %s643_s29 = sshll.u32 %s218_s21, 4  ;;  %s1358_s26 = scalar_lea.hbm %s1450_s2, %s809_s9  ;;  %s1360_s29 = int_to_ptr.vmem [resolvable:$true] %s643_s29 }
  0x60   : > { %914 = vset.pattern.permute.xlu1 %v1106_v3  ;;  %912 = vset.pattern.permute.xlu0 %v1107_v4  ;;  %s1362_s4 = scalar_lea.vmem [#allocation8], %s791_s6  ;;  %s622_s7 = scalar_lea.sflag [#allocation4], %s1295_s10 }
  0x61   : > { %265 = vperm.xlu1 %914, %v226_v2   ;;  %230 = vperm.xlu0 %912, %v226_v2   ;;  %s659_s30 = sshll.u32 %s1362_s4, 4  ;;  %s982_s8 = scalar_lea.vmem %s1360_s29, 32  ;;  %s1398_s30 = int_to_ptr.vmem [resolvable:$true] %s659_s30 }
  0x62   : > { %p983_p11 = scmp.ne.s32.totalorder %s1360_s29, %s982_s8  ;;  %s1122_s11 = smov [#allocation7]  }
  0x63   : > { %s986_s18 = sshll.u32 %s1122_s11, 4  ;;  %s987_s18 = int_to_ptr.vmem [resolvable:$false] %s986_s18 }
  0x64   : > { %p984_p6 = pnand %p983_p11, %p1245_p13  ;;  %p989_p9 = scmp.lt.s32.totalorder %s1360_s29, %s987_s18 }
  0x65   : > { %915 = vset.pattern.permute.xlu1 %v1108_v5  ;;  %916 = vset.pattern.permute.xlu0 %v1109_v6  ;;  %v1115_v5 = vmov 2102212464  }
  0x66   : > { %278 = vperm.xlu1 %915, %v226_v2   ;;  %291 = vperm.xlu0 %916, %v226_v2   ;;  %p985_p8 = pneg %p984_p6 }
  0x6a   : > { %917 = vset.pattern.permute.xlu1 %v1110_v7  ;;  %919 = vset.pattern.permute.xlu0 %v1111_v8 }
  0x6b   : > { %304 = vperm.xlu1 %917, %v226_v2  }
  0x6f   : > { %918 = vset.pattern.permute.xlu1 %v1111_v8  ;;  %v1116_v8 = vmov 920167782  }
  0x70   : > { %317 = vperm.xlu1 %918, %v226_v2   ;;  %v1114_v2 = vmov 2131351028  }
  0xdb   : > { %v253_v12 = vpop.permute.xlu1 %252  ;;  %v240_v13 = vpop.permute.xlu0 %239 }
  0xdc   : > { %v245_v14 = vrot.slane %v240_v13, %v235_v11  ;;  %v258_v16 = vrot.slane %v253_v12, %v235_v11  ;;  %v1117_v13 = vmov 1326507024  }
  0xde   : > { %v246_v17 = vmul.f32 %v245_v14, %v227_v15  ;;  %v259_v20 = vmul.f32 %v258_v16, %v227_v15 }
  0xe0   : > { %v266_v18 = vpop.permute.xlu1 %265  ;;  %v231_v19 = vpop.permute.xlu0 %230  ;;  %v248_v21 = vrot.slane %v246_v17, 1  ;;  %v261_v26 = vrot.slane %v259_v20, 2 }
  0xe1   : > { %v271_v22 = vrot.slane %v266_v18, %v235_v11  ;;  %v236_v23 = vrot.slane %v231_v19, %v235_v11 }
  0xe3   : > { %v272_v24 = vmul.f32 %v271_v22, %v227_v15  ;;  %v237_v25 = vmul.f32 %v236_v23, %v227_v15 }
  0xe5   : > { %v250_v27 = vadd.f32 %v248_v21, %v237_v25  ;;  %v279_v28 = vpop.permute.xlu1 %278  ;;  %v292_v29 = vpop.permute.xlu0 %291  ;;  %v274_v32 = vrot.slane %v272_v24, 3 }
  0xe6   : > { %v284_v30 = vrot.slane %v279_v28, %v235_v11  ;;  %v297_v31 = vrot.slane %v292_v29, %v235_v11 }
  0xe7   : > { %v263_v33 = vadd.f32 %v261_v26, %v250_v27 }
  0xe8   : > { %v285_v34 = vmul.f32 %v284_v30, %v227_v15  ;;  %v298_v35 = vmul.f32 %v297_v31, %v227_v15 }
  0xe9   : > { %v276_v36 = vadd.f32 %v274_v32, %v263_v33 }
  0xea   : > { %v287_v37 = vrot.slane %v285_v34, 4  ;;  %v305_v38 = vpop.permute.xlu1 %304  ;;  %v300_v41 = vrot.slane %v298_v35, 5 }
  0xeb   : > { %v310_v39 = vrot.slane %v305_v38, %v235_v11 }
  0xec   : > { %v289_v40 = vadd.f32 %v287_v37, %v276_v36 }
  0xed   : > { %v311_v42 = vmul.f32 %v310_v39, %v227_v15 }
  0xee   : > { %v302_v44 = vadd.f32 %v300_v41, %v289_v40 }
  0xef   : > { %v318_v43 = vpop.permute.xlu1 %317  ;;  %v313_v45 = vrot.slane %v311_v42, 6 }
  0xf0   : > { %v323_v46 = vrot.slane %v318_v43, %v235_v11 }
  0xf1   : > { %v315_v48 = vadd.f32 %v313_v45, %v302_v44 }
  0xf2   : > { %v324_v47 = vmul.f32 %v323_v46, %v227_v15 }
  0xf4   : > { %v326_v49 = vrot.slane %v324_v47, 7 }
  0xf6   : > { %v1311_v50 = vadd.f32 %v326_v49, %v315_v48 }
  0xf8   : > { %v332_v51 = vand.u32 2139095040, %v1311_v50  ;;  %v329_v55 = vand.u32 2147483647, %v1311_v50  ;;  %vm331_vm7 = vcmp.lt.s32.totalorder %v1311_v50, 0  ;;  %vm421_vm15 = vweird.f32 %v1311_v50 }
  0xfa   : > { %v333_v52 = vshrl.u32 %v332_v51, 23  ;;  %v336_v59 = vand.u32 8388607, %v329_v55  ;;  %vm330_vm8 = vcmp.le.f32.partialorder %v329_v55, 0.7853982 }
  0xfc   : > { %v793_v53 = vadd.s32 4294967169, %v333_v52  ;;  %v337_v15 = vor.u32 8388608, %v336_v59 }
  0xfe   : > { %v339_v54 = vadd.s32 1, %v793_v53  ;;  %v377_v29 = vshll.u32 %v337_v15, 8 }
 0x100   : > { %vm340_vm0 = vcmp.gt.s32.totalorder %v339_v54, 0 }
 0x101   : > { %v341_v56 = vsel %vm340_vm0, %v339_v54, 0 }
 0x102   : > { %v343_v57 = vand.u32 31, %v341_v56  ;;  %v342_v60 = vshrl.u32 %v341_v56, 5 }
 0x104   : > { %v344_v58 = vsub.s32 32, %v343_v57  ;;  %v346_v62 = vshll.u32 %v1112_v61, %v343_v57  ;;  %v349_v0 = vshll.u32 %v1113_v63, %v343_v57  ;;  %v352_v4 = vshll.u32 %v1114_v2, %v343_v57 }
 0x105   : > { %v355_v7 = vshll.u32 %v1115_v5, %v343_v57  ;;  %v358_v12 = vshll.u32 %v1116_v8, %v343_v57  ;;  %vm361_vm1 = vcmp.lt.s32.totalorder %v342_v60, 1  ;;  %vm364_vm2 = vcmp.lt.s32.totalorder %v342_v60, 4 }
 0x106   : > { %v347_v1 = vshrl.u32 %v1113_v63, %v344_v58  ;;  %v350_v3 = vshrl.u32 %v1114_v2, %v344_v58  ;;  %v353_v6 = vshrl.u32 %v1115_v5, %v344_v58  ;;  %v356_v11 = vshrl.u32 %v1116_v8, %v344_v58 }
 0x107   : > { %v359_v14 = vshrl.u32 %v1117_v13, %v344_v58  ;;  %v345_v24 = vshrl.u32 %v1112_v61, %v344_v58  ;;  %vm363_vm3 = vcmp.lt.s32.totalorder %v342_v60, 3  ;;  %vm362_vm4 = vcmp.lt.s32.totalorder %v342_v60, 2 }
 0x108   : > { %v348_v16 = vor.u32 %v347_v1, %v346_v62  ;;  %v351_v17 = vor.u32 %v350_v3, %v349_v0  ;;  %v354_v18 = vor.u32 %v353_v6, %v352_v4  ;;  %v357_v19 = vor.u32 %v356_v11, %v355_v7 }
 0x109   : > { %v360_v20 = vor.u32 %v359_v14, %v358_v12 }
 0x10a   : > { %v366_v21 = vsel %vm364_vm2, %v354_v18, 2102212464  ;;  %v369_v22 = vsel %vm361_vm1, %v348_v16, %v351_v17  ;;  %v373_v23 = vsel %vm361_vm1, %v351_v17, %v354_v18  ;;  %v370_v25 = vsel %vm364_vm2, %v357_v19, 920167782 }
 0x10b   : > { %v374_v26 = vsel %vm364_vm2, %v360_v20, 1326507024  ;;  %v371_v27 = vsel %vm363_vm3, %v354_v18, %v370_v25  ;;  %v365_v30 = vsel %vm361_vm1, %v345_v24, %v348_v16  ;;  %v367_v31 = vsel %vm363_vm3, %v351_v17, %v366_v21 }
 0x10c   : > { %v375_v28 = vsel %vm363_vm3, %v357_v19, %v374_v26  ;;  %v372_v32 = vsel %vm362_vm4, %v369_v22, %v371_v27  ;;  %v368_v38 = vsel %vm362_vm4, %v365_v30, %v367_v31  ;;  %v537_v24 = vand.u32 127, %v233_v9 }
 0x10d   : > { %v376_v33 = vsel %vm362_vm4, %v373_v23, %v375_v28  ;;  %v1320_v36 = vmul.u32.u64.low %v377_v29, %v372_v32  ;;  %v1321_v37 = vmul.u32.u64.high %v377_v29, %v372_v32, %v1320_v36  ;;  %v384_v40 = vmul.u32 %v377_v29, %v368_v38 }
 0x10e   : > { %v1317_v34 = vmul.u32.u64.low %v377_v29, %v376_v33  ;;  %v1318_v35 = vmul.u32.u64.high %v377_v29, %v376_v33, %v1317_v34  ;;  %vm540_vm0 = vcmp.lt.s32.totalorder %v537_v24, 64  ;;  %vm545_vm1 = vcmp.ge.s32.totalorder %v537_v24, 32 }
 0x10f   : > { %v387_v39 = vadd.s32 1, %v1321_v37  ;;  %vm546_vm2 = vcmp.lt.s32.totalorder %v537_v24, 96  ;;  %v551_v38 = vand.u32 63, %v537_v24 }
 0x110   : > { %vm386_vm5 = vc.u32 %v1318_v35, %v1320_v36  ;;  %v385_v53 = vadd.s32 %v1320_v36, %v1318_v35  ;;  %vm547_vm3 = vmand %vm545_vm1, %vm546_vm2 }
 0x111   : > { %v388_v41 = vsel %vm386_vm5, %v387_v39, %v1321_v37  ;;  %v1121_v39 = vmov 1966171168   ;;  %vm552_vm4 = vcmp.ge.s32.totalorder %v551_v38, 16  ;;  %vm553_vm5 = vcmp.lt.s32.totalorder %v551_v38, 48 }
 0x112   : > { %v389_v42 = vadd.s32 %v388_v41, %v384_v40  ;;  %v583_v40 = vunpack.c.l.s4 %v1121_v39 }
 0x114   : > { %v390_v43 = vadd.s32 536870912, %v389_v42  ;;  %v584_v41 = vunpack.c.0.s8 %v583_v40 }
 0x116   : > { %v391_v44 = vshrl.u32 %v390_v43, 30 }
 0x118   : > { %v392_v45 = vshll.u32 %v391_v44, 30  ;;  %v415_v2 = vsub.s32 4, %v391_v44 }
 0x11a   : > { %v393_v46 = vsub.s32 %v389_v42, %v392_v45  ;;  %v416_v5 = vsel %vm331_vm7, %v415_v2, %v391_v44  ;;  %v587_v44 = vsub.s32 %v584_v41, %v1308_v10 }
 0x11b   : > { %v418_v7 = vsel %vm330_vm8, 0, %v416_v5 }
 0x11c   : > { %v395_v47 = vsub.s32 0, %v393_v46  ;;  %v525_v8 = vadd.s32 3, %v418_v7  ;;  %v422_v12 = vand.u32 3, %v418_v7 }
 0x11e   : > { %v794_v48 = vmin.u32 %v395_v47, %v393_v46  ;;  %v526_v11 = vand.u32 3, %v525_v8  ;;  %vm427_vm10 = vcmp.eq.s32.totalorder %v422_v12, 2  ;;  %vm424_vm12 = vcmp.eq.s32.totalorder %v422_v12, 0 }
 0x11f   : > { %vm423_vm14 = vcmp.lt.s32.totalorder %v422_v12, 2 }
 0x120   : > { %v397_v49 = vclz %v794_v48  ;;  %vm531_vm9 = vcmp.eq.s32.totalorder %v526_v11, 2  ;;  %vm528_vm11 = vcmp.eq.s32.totalorder %v526_v11, 0  ;;  %vm527_vm13 = vcmp.lt.s32.totalorder %v526_v11, 2 }
 0x122   : > { %v795_v51 = vadd.s32 4294967294, %v397_v49 }
 0x124   : > { %vm796_vm6 = vcmp.lt.s32.totalorder %v795_v51, 0 }
 0x125   : > { %v400_v52 = vsel %vm796_vm6, 0, %v795_v51  ;;  %vm1333_vm6 = vmand %vm552_vm4, %vm553_vm5 }
 0x126   : > { %v401_v54 = vsub.s32 32, %v400_v52  ;;  %v405_v56 = vsub.s32 4294967266, %v400_v52  ;;  %v402_v57 = vshll.u32 %v393_v46, %v400_v52 }
 0x128   : > { %v403_v58 = vshrl.u32 %v385_v53, %v401_v54  ;;  %v406_v59 = vadd.s32 127, %v405_v56 }
 0x12a   : > { %v404_v60 = vor.u32 %v403_v58, %v402_v57  ;;  %v407_v61 = vshll.u32 %v406_v59, 23 }
 0x12c   : > { %v408_v62 = vor.u32 4788187, %v407_v61  ;;  %v411_v0 = vcvt.s32.f32 %v404_v60 }
 0x12e   : > { %v409_v63 = vand.u32 2147483647, %v408_v62 }
 0x130   : > { %v412_v1 = vmul.f32 %v411_v0, %v409_v63 }
 0x132   : > { %v413_v3 = vxor.u32 2147483648, %v412_v1 }
 0x134   : > { %v414_v4 = vsel %vm331_vm7, %v413_v3, %v412_v1  ;;  %vm1349_vm7 = vcmp.lt.s32.totalorder %v233_v9, 256 }
 0x135   : > { %v417_v6 = vsel %vm330_vm8, %v1311_v50, %v414_v4 }
 0x136   : > { %920 = vcosq.f32 %v417_v6 }
 0x137   : > { %922 = vsinq.f32 %v417_v6 }
 0x140   : > { %v921_v13 = vpop.eup %920 }
 0x141   : > { %v923_v14 = vpop.eup %922  ;;  %v428_v15 = vxor.u32 2147483648, %v921_v13 }
 0x142   : > { %v425_v16 = vxor.u32 2147483648, %v923_v14 }
 0x143   : > { %v533_v17 = vsel %vm531_vm9, %v428_v15, %v923_v14  ;;  %v429_v55 = vsel %vm427_vm10, %v428_v15, %v923_v14 }
 0x144   : > { %v530_v18 = vsel %vm528_vm11, %v921_v13, %v425_v16  ;;  %v426_v19 = vsel %vm424_vm12, %v921_v13, %v425_v16 }
 0x145   : > { %v534_v20 = vsel %vm527_vm13, %v530_v18, %v533_v17  ;;  %v430_v21 = vsel %vm423_vm14, %v426_v19, %v429_v55 }
 0x146   : > { %v535_v22 = vsel %vm421_vm15, nan, %v534_v20  ;;  %v431_v23 = vsel %vm421_vm15, nan, %v430_v21 }
 0x147   : > { %563 = vrot.lane.b32.xlu1 %v535_v22, %s1118_s20  ;;  %538 = vrot.lane.b32.xlu0 %v431_v23, %s1118_s20  ;;  %s988_s20 = scalar_lea.vmem %s987_s18, 64 }
 0x148   : > { %p990_p12 = scmp.lt.s32.totalorder %s988_s20, %s982_s8 }
 0x14a   : > { %p991_p0 = por %p990_p12, %p989_p9 }
 0x14c   : > { %p992_p5 = pnand %p991_p0, %p985_p8 }
 0x1b9   : > { %v539_v25 = vpop.permute.xlu0 %538  ;;  %v564_v28 = vpop.permute.xlu1 %563 }
 0x1ba   : > { %v556_v26 = vsel %vm540_vm0, %v539_v25, %v431_v23  ;;  %v541_v27 = vsel %vm540_vm0, %v431_v23, %v539_v25  ;;  %v572_v29 = vsel %vm540_vm0, %v564_v28, %v535_v22  ;;  %v565_v30 = vsel %vm540_vm0, %v535_v22, %v564_v28 }
 0x1bb   : > { %557 = vrot.lane.b32.xlu1 %v556_v26, %s1119_s22  ;;  %542 = vrot.lane.b32.xlu0 %v541_v27, %s1119_s22 }
 0x1bf   : > { %573 = vrot.lane.b32.xlu1 %v572_v29, %s1119_s22  ;;  %566 = vrot.lane.b32.xlu0 %v565_v30, %s1119_s22 }
 0x22d   : > { %v558_v50 = vpop.permute.xlu1 %557  ;;  %v543_v31 = vpop.permute.xlu0 %542 }
 0x22e   : > { %v559_v32 = vsel %vm547_vm3, %v558_v50, %v556_v26  ;;  %v548_v33 = vsel %vm547_vm3, %v543_v31, %v541_v27 }
 0x22f   : > { %560 = vrot.lane.b32.xlu1 %v559_v32, %s1120_s24  ;;  %549 = vrot.lane.b32.xlu0 %v548_v33, %s1120_s24 }
 0x231   : > { %v574_v34 = vpop.permute.xlu1 %573  ;;  %v567_v35 = vpop.permute.xlu0 %566 }
 0x232   : > { %v575_v36 = vsel %vm547_vm3, %v574_v34, %v572_v29  ;;  %v568_v37 = vsel %vm547_vm3, %v567_v35, %v565_v30 }
 0x233   : > { %576 = vrot.lane.b32.xlu1 %v575_v36, %s1120_s24  ;;  %569 = vrot.lane.b32.xlu0 %v568_v37, %s1120_s24 }
 0x2a1   : > { %v561_v43 = vpop.permute.xlu1 %560  ;;  %v550_v45 = vpop.permute.xlu0 %549 }
 0x2a2   : > { %v562_v46 = vsel %vm1333_vm6, %v561_v43, %v559_v32  ;;  %v555_v47 = vsel %vm1333_vm6, %v550_v45, %v548_v33 }
 0x2a3   : > { %v581_v48 = vcombine.low %v555_v47, %v562_v46 }
 0x2a5   : > { %v588_v49 = vrot.slane %v581_v48, %v587_v44  ;;  %v577_v51 = vpop.permute.xlu1 %576  ;;  %v570_v52 = vpop.permute.xlu0 %569 }
 0x2a6   : > { %v578_v10 = vsel %vm1333_vm6, %v577_v51, %v575_v36  ;;  %v571_v53 = vsel %vm1333_vm6, %v570_v52, %v568_v37 }
 0x2a7   : > { %v595_v56 = vrot.slane %v588_v49, %v587_v44  ;;  %v604_v57 = vcombine.low %v571_v53, %v578_v10 }
 0x2a9   : > { %v611_v9 = vrot.slane %v604_v57, %v587_v44  ;;  %601 = vst.msk [vmem:[%s218_s21] sm:$0x3] %vm1349_vm7, %v595_v56 }
 0x2aa   : > { %995 = shalt.err (!%p992_p5)
}
 0x2ab   : > { %s996_s22 = scalar_lea.hbm %s1358_s26, 32  ;;  %s1000_s21 = scalar_lea.hbm %s1450_s2, 64 }
 0x2ac   : > { %p997_p10 = scmp.ne.s32.totalorder %s1358_s26, %s996_s22  ;;  %p1001_p7 = scmp.lt.u32.totalorder %s1358_s26, %s1450_s2 }
 0x2ad   : > { %p1002_p3 = scmp.lt.u32.totalorder %s1000_s21, %s996_s22  ;;  %p1004_p11 = scmp.lt.u32.totalorder %s996_s22, %s1358_s26 }
 0x2ae   : > { %p998_p4 = pnand %p997_p10, %p1245_p13 }
 0x2af   : > { %p1003_p2 = por %p1002_p3, %p1001_p7 }
 0x2b0   : > { %p999_p1 = pneg %p998_p4 }
 0x2b1   : > { %p1005_p6 = por %p1004_p11, %p1003_p2 }
 0x2b3   : > { %p1006_p8 = pnand %p1005_p6, %p999_p1 }
 0x2b5   : > { %1009 = shalt.err (!%p1006_p8)
}
 0x2b6   : > { %821 = dma.vmem_to_hbm [thread:$0]  (%p1245_p13), %s1360_s29, 32, %s1358_s26, %s622_s7   ;;  %v618_v58 = vrot.slane %v611_v9, %v587_v44 }
 0x2b7   : > { %s1394_s18 = scalar_lea.hbm %s1451_s3, %s809_s9  ;;  %s627_s20 = scalar_lea.sflag [#allocation9], %s1295_s10 }
 0x2b8   : > { %620 = vst.msk [vmem:[%s1362_s4] sm:$0x3] %vm1349_vm7, %v618_v58  ;;  %s1010_s22 = scalar_lea.vmem %s1398_s30, 32  ;;  %s1123_s15 = smov [#allocation8]  }
 0x2b9   : > { %p1011_p9 = scmp.ne.s32.totalorder %s1398_s30, %s1010_s22  ;;  %s1014_s29 = sshll.u32 %s1123_s15, 4  ;;  %s1015_s29 = int_to_ptr.vmem [resolvable:$false] %s1014_s29 }
 0x2ba   : > { %s1016_s9 = scalar_lea.vmem %s1015_s29, 64  ;;  %p1017_p5 = scmp.lt.s32.totalorder %s1398_s30, %s1015_s29 }
 0x2bb   : > { %p1012_p12 = pnand %p1011_p9, %p1245_p13  ;;  %p1018_p10 = scmp.lt.s32.totalorder %s1016_s9, %s1010_s22 }
 0x2bd   : > { %p1013_p0 = pneg %p1012_p12  ;;  %p1019_p4 = por %p1018_p10, %p1017_p5 }
 0x2bf   : > { %p1020_p1 = pnand %p1019_p4, %p1013_p0 }
 0x2c1   : > { %1023 = shalt.err (!%p1020_p1)
}
 0x2c2   : > { %s1024_s10 = scalar_lea.hbm %s1394_s18, 32  ;;  %s1028_s7 = scalar_lea.hbm %s1451_s3, 64 }
 0x2c3   : > { %p1025_p7 = scmp.ne.s32.totalorder %s1394_s18, %s1024_s10  ;;  %p1029_p11 = scmp.lt.u32.totalorder %s1394_s18, %s1451_s3 }
 0x2c4   : > { %p1030_p6 = scmp.lt.u32.totalorder %s1028_s7, %s1024_s10  ;;  %p1032_p9 = scmp.lt.u32.totalorder %s1024_s10, %s1394_s18 }
 0x2c5   : > { %p1026_p3 = pnand %p1025_p7, %p1245_p13 }
 0x2c6   : > { %p1031_p8 = por %p1030_p6, %p1029_p11 }
 0x2c7   : > { %p1027_p2 = pneg %p1026_p3 }
 0x2c8   : > { %p1033_p12 = por %p1032_p9, %p1031_p8 }
 0x2ca   : > { %p1034_p0 = pnand %p1033_p12, %p1027_p2 }
 0x2cc   : > { %1037 = shalt.err (!%p1034_p0)
}
 0x2cd   : > { %822 = dma.vmem_to_hbm [thread:$0]  (%p1245_p13), %s1398_s30, 32, %s1394_s18, %s627_s20  }
 0x2ce PF: > { %s671_s21 = sand.u32 1, %s1080_s12   ;;  %p1474_p5 = scmp.ne.s32.totalorder %s1459_s23, 0 }
 0x2cf   : > { %p1475_p10 = scmp.ge.s32.totalorder %s1100_s17, 2  ;;  %s672_s19 = scalar_lea.sflag [#allocation4], %s671_s21 }
 0x2d1   : > { %p834_p4 = pnand %p1475_p10, %p1474_p5 }
 0x2d3   : > { %1071 = dma.done.wait (!%p834_p4), %s672_s19, 32  }
 0x2d4   : > { %1073 = vsyncadd (!%p834_p4), %s672_s19, 4294967264  ;;  %s681_s25 = scalar_lea.sflag [#allocation9], %s671_s21 }
 0x2d5   : > { %1075 = dma.done.wait (!%p834_p4), %s681_s25, 32  }
 0x2d6   : > { %1077 = vsyncadd (!%p834_p4), %s681_s25, 4294967264  ;;  %s24_s17 = sadd.s32 1, %s1100_s17   ;;  %s1476_s12 = smov %s1084_s13 }
 0x2d7   : > { %p21_p1 = scmp.ge.s32.totalorder %s24_s17, 4   ;;  %s1477_s13 = smov %s1088_s14 }
 0x2d8   : > { %s1478_s14 = smov %s1253_s5  ;;  %s1479_s15 = smov %s1096_s16 }
 0x2d9   : > { %s1480_s16 = smov %s1482_s28  ;;  %23 = sbr.rel (!%p21_p1) target bundleno = 9 (0x9), region = 94 }
 0x2e0   :  { %686 = vsyncpa [#allocation3], 1 }
 0x2e1   :  { %688 = vsyncpa [#allocation3 + $0x1], 1 }
 0x2e2   :  { %689 = vsyncpa [#allocation6], 1 }
 0x2e3   :  { %690 = vsyncpa [#allocation4], 1 }
 0x2e4   :  { %692 = vsyncpa [#allocation4 + $0x1], 1 }
 0x2e5   :  { %693 = vsyncpa [#allocation9], 1 }
 0x2e6   :  { %695 = vsyncpa [#allocation9 + $0x1], 1 }

</bundles_post_ra>
